<compile_context>
chip_gen: v5e
topology: v5e:2x2
jax: 0.10.0
libtpu: 0.0.40
codegen_flags: <defaults>
</compile_context>

<pallas_src>
import jax
import jax.numpy as jnp
from jax.experimental import pallas as pl
from jax.experimental.pallas import tpu as pltpu


# ---------------------------------------------------------------------------
# Kernels: one row tile per grid step, writes weighted per-row losses (tr, 1).
# ---------------------------------------------------------------------------

def _hard_ce_kernel(logits_ref, labels_ref, w_ref, out_ref):
    """Weighted hard-label cross-entropy per row for one row tile."""
    x = logits_ref[...].astype(jnp.float32)                           # (tr, C)
    m = jnp.max(x, axis=-1, keepdims=True)                            # (tr, 1)
    lse = m + jnp.log(jnp.sum(jnp.exp(x - m), axis=-1, keepdims=True))
    labels = labels_ref[...]                                          # (tr, 1) int32
    col = jax.lax.broadcasted_iota(jnp.int32, x.shape, 1)             # (tr, C)
    picked = jnp.sum(jnp.where(col == labels, x, jnp.float32(0.0)),
                     axis=-1, keepdims=True)                          # (tr, 1)
    # TODO(synk): no ignore_index handling (PyTorch's -100); labels are assumed in [0, C).
    out_ref[...] = w_ref[...] * (lse - picked)


def _soft_ce_kernel(logits_ref, targets_ref, w_ref, out_ref):
    """Weighted soft-target cross-entropy per row for one row tile."""
    x = logits_ref[...].astype(jnp.float32)                           # (tr, C)
    t = targets_ref[...].astype(jnp.float32)                          # (tr, C)
    m = jnp.max(x, axis=-1, keepdims=True)
    lse = m + jnp.log(jnp.sum(jnp.exp(x - m), axis=-1, keepdims=True))
    t_sum = jnp.sum(t, axis=-1, keepdims=True)                        # (tr, 1)
    tx = jnp.sum(t * x, axis=-1, keepdims=True)                       # (tr, 1)
    # -sum(t * (x - lse)) == lse*sum(t) - sum(t*x)
    out_ref[...] = w_ref[...] * (lse * t_sum - tx)


# ---------------------------------------------------------------------------
# Wrapper helpers
# ---------------------------------------------------------------------------

def _round_up(n, m):
    return ((n + m - 1) // m) * m


def _sublane_unit(dtype):
    # Native packed sublane tile: 8 rows for 4-byte, 16 for 2-byte, 32 for 1-byte.
    return {4: 8, 2: 16, 1: 32}.get(jnp.dtype(dtype).itemsize, 8)


def _vmem_budget(n_big_inputs):
    """(per-big-input block byte cap, scoped vmem limit) sized per TPU generation."""
    try:
        info = pltpu.get_tpu_info()
        phys = int(getattr(info, "vmem_capacity_bytes", 64 << 20))
    except Exception:
        phys = 64 << 20  # conservative: assume v7x-sized VMEM
    if phys >= (96 << 20):
        # v5e / v6e: 128 MiB physical VMEM -> big blocks, raise scoped limit.
        db_budget, vmem_limit = 32 << 20, 64 << 20
    else:
        # v7x: 64 MiB physical VMEM -> keep double-buffered totals modest.
        db_budget, vmem_limit = 16 << 20, 48 << 20
    # db_budget covers (n_big_inputs big streams) x (2 pipeline buffers).
    return db_budget // (2 * n_big_inputs), vmem_limit


def _choose_row_tile(n_pad, n_classes, itemsize, su, per_block_cap):
    """Largest row tile that divides n_pad, is a multiple of su, fits the block
    cap, and leaves >= 2 grid steps when possible (v7x megacore)."""
    rows_cap = max(su, (per_block_cap // max(1, n_classes * itemsize)) // su * su)
    desired = min(rows_cap, n_pad)
    if n_pad >= 2 * su:
        desired = min(desired, max(su, n_pad // 2))
    tr = su
    d = (desired // su) * su
    while d >= su:
        if n_pad % d == 0:
            tr = d
            break
        d -= su
    return tr


# ---------------------------------------------------------------------------
# Public entry point
# ---------------------------------------------------------------------------

def classification_loss(logits, labels, alpha, use_soft_labels=False):
    """
    logits: list (len T) of [B, C] arrays, OR a pre-stacked [T, B, C] array
            (preferred — avoids an extra full HBM pass for the stack).
    labels: list (len T) of [B] int arrays (hard) or [B, C] float arrays (soft),
            or the corresponding pre-stacked [T, B] / [T, B, C] array.
    alpha:  list (len T) of per-stage weights.
    Returns scalar L_cls = sum_t alpha[t] * CE(logits[t], labels[t]).
    """
    if isinstance(logits, (list, tuple)):
        logits = jnp.stack(logits)
    if isinstance(labels, (list, tuple)):
        labels = jnp.stack(labels)

    T, B, C = logits.shape
    N = T * B

    logits2 = logits.reshape(N, C)                 # collapse of leading dims: cheap
    alpha_arr = jnp.asarray(alpha, dtype=jnp.float32).reshape(T, 1) / jnp.float32(B)
    weights = jnp.broadcast_to(alpha_arr, (T, B)).reshape(N, 1)       # [N, 1]

    if use_soft_labels:
        targets2 = labels.reshape(N, C)
        su = max(_sublane_unit(logits.dtype), _sublane_unit(labels.dtype))
        big_itemsize = max(jnp.dtype(logits.dtype).itemsize,
                           jnp.dtype(labels.dtype).itemsize)
        n_big = 2
    else:
        labels2 = labels.reshape(N, 1).astype(jnp.int32)
        su = _sublane_unit(logits.dtype)
        big_itemsize = jnp.dtype(logits.dtype).itemsize
        n_big = 1

    # Prefer the dtype-native sublane unit, but never force a whole-array pad of
    # the logits just for nicer packing.
    if N % su != 0 and N % 8 == 0:
        su = 8
    n_pad = _round_up(N, su)   # == N whenever N is a multiple of 8 (usual case)

    per_block_cap, vmem_limit = _vmem_budget(n_big)
    tr = _choose_row_tile(n_pad, C, big_itemsize, su, per_block_cap)
    grid = (n_pad // tr,)

    def pad_rows(a):
        # Only hit when N is not a multiple of 8; pads with zeros (padded rows get
        # weight 0 -> zero contribution; zero logits give a finite lse, no NaN).
        if a.shape[0] == n_pad:
            return a
        widths = [(0, n_pad - a.shape[0])] + [(0, 0)] * (a.ndim - 1)
        return jnp.pad(a, widths)

    row_spec = pl.BlockSpec((tr, C), lambda i: (i, 0))   # full C on lanes
    col_spec = pl.BlockSpec((tr, 1), lambda i: (i, 0))   # per-row scalars
    out_spec = pl.BlockSpec((tr, 1), lambda i: (i, 0))   # weighted row losses
    cparams = pltpu.CompilerParams(
        dimension_semantics=("parallel",),
        vmem_limit_bytes=vmem_limit,
    )

    # TODO(synk): for small C (<128), pack k=128//C rows into the lane dimension;
    # for vocab-sized C, tile the class axis with an online LSE (row axis parallel,
    # class axis arbitrary, VMEM scratch for running m/l).

    if use_soft_labels:
        row_losses = pl.pallas_call(
            _soft_ce_kernel,
            out_shape=jax.ShapeDtypeStruct((n_pad, 1), jnp.float32),
            grid=grid,
            in_specs=[row_spec, row_spec, col_spec],
            out_specs=out_spec,
            compiler_params=cparams,
        )(pad_rows(logits2), pad_rows(targets2), pad_rows(weights))
    else:
        row_losses = pl.pallas_call(
            _hard_ce_kernel,
            out_shape=jax.ShapeDtypeStruct((n_pad, 1), jnp.float32),
            grid=grid,
            in_specs=[row_spec, col_spec, col_spec],
            out_specs=out_spec,
            compiler_params=cparams,
        )(pad_rows(logits2), pad_rows(labels2), pad_rows(weights))

    return jnp.sum(row_losses)


# ---------------------------------------------------------------------------
# Pure-JAX reference (matches the PyTorch forward) + self-test
# ---------------------------------------------------------------------------

def _reference_loss(logits_list, labels_list, alpha, use_soft_labels):
    total = 0.0
    for t in range(len(logits_list)):
        x = logits_list[t].astype(jnp.float32)
        logp = jax.nn.log_softmax(x, axis=1)
        if use_soft_labels:
            tgt = labels_list[t].astype(jnp.float32)
        else:
            tgt = jax.nn.one_hot(labels_list[t], x.shape[1], dtype=jnp.float32)
        total += alpha[t] * jnp.mean(-jnp.sum(tgt * logp, axis=1))
    return total


if __name__ == "__main__":
    key = jax.random.PRNGKey(0)
    num_stages = 3
    batch, num_classes = 8, 32
    alpha = [0.5, 0.3, 0.2]

    keys = jax.random.split(key, 2 * num_stages)
    logits_list = [jax.random.normal(keys[i], (batch, num_classes), dtype=jnp.float32)
                   for i in range(num_stages)]

    # --- hard-label mode (use_soft_labels=False, nn.CrossEntropyLoss) ---
    hard_labels = [jax.random.randint(keys[num_stages + i], (batch,), 0, num_classes)
                   for i in range(num_stages)]
    loss_hard = jax.block_until_ready(
        classification_loss(logits_list, hard_labels, alpha, use_soft_labels=False))
    ref_hard = _reference_loss(logits_list, hard_labels, alpha, False)

    # --- soft-label mode (SoftTargetCrossEntropy) ---
    soft_raw = [jax.random.uniform(keys[num_stages + i], (batch, num_classes))
                for i in range(num_stages)]
    soft_labels = [s / jnp.sum(s, axis=1, keepdims=True) for s in soft_raw]
    loss_soft = jax.block_until_ready(
        classification_loss(logits_list, soft_labels, alpha, use_soft_labels=True))
    ref_soft = _reference_loss(logits_list, soft_labels, alpha, True)

    assert jnp.allclose(loss_hard, ref_hard, rtol=1e-5, atol=1e-5), (loss_hard, ref_hard)
    assert jnp.allclose(loss_soft, ref_soft, rtol=1e-5, atol=1e-5), (loss_soft, ref_soft)

    print("KERNEL_OK")
</pallas_src>

<mosaic_0001>
module attributes {stable_mosaic.version = 11 : i64} {
  func.func @_hard_ce_kernel(%arg0: i32, %arg1: memref<8x32xf32, #tpu.memory_space<vmem>>, %arg2: memref<8x1xi32, #tpu.memory_space<vmem>>, %arg3: memref<8x1xf32, #tpu.memory_space<vmem>>, %arg4: memref<8x1xf32, #tpu.memory_space<vmem>>) attributes {dimension_semantics = [#tpu.dimension_semantics<parallel>], iteration_bounds = array<i64: 3>, scalar_prefetch = 0 : i64, scratch_operands = 0 : i64, tpu.core_type = #tpu.core_type<tc>, window_params = [{transform_indices = @transform_0, window_bounds = array<i64: 8, 32>}, {transform_indices = @transform_1, window_bounds = array<i64: 8, 1>}, {transform_indices = @transform_2, window_bounds = array<i64: 8, 1>}, {transform_indices = @transform_3, window_bounds = array<i64: 8, 1>}]} {
    %c0 = arith.constant 0 : index
    %c0_0 = arith.constant 0 : index
    %0 = vector.load %arg1[%c0, %c0_0] : memref<8x32xf32, #tpu.memory_space<vmem>>, vector<8x32xf32>
    %cst = arith.constant dense<0xFF800000> : vector<8xf32>
    %1 = vector.multi_reduction <maximumf>, %0, %cst [1] : vector<8x32xf32> to vector<8xf32>
    %2 = vector.shape_cast %1 : vector<8xf32> to vector<8x1xf32>
    %3 = vector.broadcast %2 : vector<8x1xf32> to vector<8x32xf32>
    %4 = arith.subf %0, %3 : vector<8x32xf32>
    %5 = math.exp %4 : vector<8x32xf32>
    %cst_1 = arith.constant dense<0.000000e+00> : vector<8xf32>
    %6 = vector.multi_reduction <add>, %5, %cst_1 [1] : vector<8x32xf32> to vector<8xf32>
    %7 = vector.shape_cast %6 : vector<8xf32> to vector<8x1xf32>
    %8 = math.log %7 : vector<8x1xf32>
    %9 = arith.addf %2, %8 : vector<8x1xf32>
    %c0_2 = arith.constant 0 : index
    %c0_3 = arith.constant 0 : index
    %10 = vector.load %arg2[%c0_2, %c0_3] : memref<8x1xi32, #tpu.memory_space<vmem>>, vector<8x1xi32>
    %11 = tpu.iota {dimensions = array<i32: 1>} : vector<8x32xi32>
    %12 = vector.broadcast %10 : vector<8x1xi32> to vector<8x32xi32>
    %13 = arith.cmpi eq, %11, %12 : vector<8x32xi32>
    %cst_4 = arith.constant 0.000000e+00 : f32
    %14 = vector.broadcast %cst_4 : f32 to vector<8x32xf32>
    %15 = arith.select %13, %0, %14 : vector<8x32xi1>, vector<8x32xf32>
    %cst_5 = arith.constant dense<0.000000e+00> : vector<8xf32>
    %16 = vector.multi_reduction <add>, %15, %cst_5 [1] : vector<8x32xf32> to vector<8xf32>
    %17 = vector.shape_cast %16 : vector<8xf32> to vector<8x1xf32>
    %c0_6 = arith.constant 0 : index
    %c0_7 = arith.constant 0 : index
    %18 = vector.load %arg3[%c0_6, %c0_7] : memref<8x1xf32, #tpu.memory_space<vmem>>, vector<8x1xf32>
    %19 = arith.subf %9, %17 : vector<8x1xf32>
    %20 = arith.mulf %18, %19 : vector<8x1xf32>
    %c0_8 = arith.constant 0 : index
    %c0_9 = arith.constant 0 : index
    %21 = vector.load %arg4[%c0_8, %c0_9] : memref<8x1xf32, #tpu.memory_space<vmem>>, vector<8x1xf32>
    tpu.vector_store %arg4[%c0_8, %c0_9], %20 {strides = array<i32>} : memref<8x1xf32, #tpu.memory_space<vmem>>, vector<8x1xf32>,
    return
  }
  func.func @transform_0(%arg0: i32) -> (i32, i32) {
    %c0_i32 = arith.constant 0 : i32
    %c0_i32_0 = arith.constant 0 : i32
    return %arg0, %c0_i32 : i32, i32
  }
  func.func @transform_1(%arg0: i32) -> (i32, i32) {
    %c0_i32 = arith.constant 0 : i32
    %c0_i32_0 = arith.constant 0 : i32
    return %arg0, %c0_i32 : i32, i32
  }
  func.func @transform_2(%arg0: i32) -> (i32, i32) {
    %c0_i32 = arith.constant 0 : i32
    %c0_i32_0 = arith.constant 0 : i32
    return %arg0, %c0_i32 : i32, i32
  }
  func.func @transform_3(%arg0: i32) -> (i32, i32) {
    %c0_i32 = arith.constant 0 : i32
    %c0_i32_0 = arith.constant 0 : i32
    return %arg0, %c0_i32 : i32, i32
  }
}

</mosaic_0001>

<bundles_post_ra>
// kernel: tpu_custom_call.1
= control target key start
LH: loop header
LB: loop body
LE: loop exit
PB: predicated region body
PF: predicated region fallthrough
CT: control target
= control target key end

     0   :  { %s361_s12 = smov 0   ;;  %s393_s0 = inlined_call_operand.vmem [shape: f32[24,32], index: 0, kind: input, shape index: {}]   ;;  %s394_s1 = inlined_call_operand.vmem [shape: s32[24,1], index: 1, kind: input, shape index: {}]   ;;  %s395_s2 = inlined_call_operand.vmem [shape: f32[24,1], index: 2, kind: input, shape index: {}]   ;;  %s396_s3 = inlined_call_operand.vmem [shape: f32[24,1], index: 3, kind: output, shape index: {}]  }
   0x1 LB: > { %s307_s13 = sadd.s32 4294967295, %s338_s12   ;;  %p311_p0 = scmp.ge.s32.totalorder %s338_s12, 1  ;;  %s338_s12 = sphi %s361_s12, %s13_s12  }
   0x2   : > { %p154_p1 = scmp.lt.s32.totalorder %s338_s12, 4 }
   0x4   : > { %p155_p2 = pnand %p311_p0, %p154_p1 }
   0x5   : > { %p184_p3 = scmp.lt.s32.totalorder (!%p155_p2), %s307_s13, 2 }
   0x6   : > { %158 = sbr.rel (%p155_p2) target bundleno = 276 (0x114), region = 32 }
   0xb   : > { %v340_v0 = vmov 0   ;;  %s398_s13 = smov (!%p184_p3, %s307_s13), 2  ;;  %vm201_vm0 = vcmask 261120   ;;  %v215_v9 = vlaneseq  ;;  %vm228_vm2 = vcmask 7168  }
   0xc   : > { %327 = vset.pattern.permute.xlu0 %v340_v0  ;;  %s369_s14 = sshll.u32 %s398_s13, 3 }
   0xd   : > { %s187_s17 = scalar_lea.vmem %s393_s0, %s369_s14  ;;  %s191_s20 = scalar_lea.vmem %s394_s1, %s369_s14  ;;  %v216_v10 = vand.u32 127, %v215_v9 }
   0xe   : > { %v200_v1 = vld [vmem:[%s187_s17] sm:$0xff]  ;;  %s195_s23 = scalar_lea.vmem %s395_s2, %s369_s14  ;;  %s199_s26 = scalar_lea.vmem %s396_s3, %s369_s14 }
   0xf   : > { %v202_v2 = vsel %vm201_vm0, %v200_v1, -inf  ;;  %v214_v3 = vld [vmem:[%s191_s20] sm:$0xff] }
  0x10   : > { %203 = vmax.xlane.f32.xlu0 %v202_v2  ;;  %v225_v19 = vld [vmem:[%s195_s23] sm:$0xff] }
  0x24   : > { %218 = vperm.xlu0 %327, %v214_v3  }
  0x83   : > { %v204_v4 = vpop.xlane.xlu0 %203 }
  0x84   : > { %v205_v5 = vsub.f32 %v200_v1, %v204_v4 }
  0x86   : > { %v206_v6 = vmul.f32 1.442695, %v205_v5 }
  0x88   : > { %328 = vpow2.f32 %v206_v6 }
  0x8e   : > { %v329_v7 = vpop.eup %328 }
  0x8f   : > { %v208_v8 = vsel %vm201_vm0, %v329_v7, 0.0 }
  0x90   : > { %209 = vadd.xlane.f32.xlu1 %v208_v8 }
  0x96   : > { %v219_v11 = vpop.permute.xlu0 %218 }
  0x97   : > { %vm220_vm1 = vcmp.eq.s32.totalorder %v216_v10, %v219_v11 }
  0x98   : > { %v221_v12 = vsel %vm220_vm1, %v200_v1, 0.0 }
  0x99   : > { %v222_v13 = vsel %vm201_vm0, %v221_v12, 0.0 }
  0x9a   : > { %223 = vadd.xlane.f32.xlu1 %v222_v13 }
 0x103   : > { %v210_v14 = vpop.xlane.xlu1 %209 }
 0x104   : > { %330 = vlog2.f32 %v210_v14 }
 0x10a   : > { %v331_v15 = vpop.eup %330 }
 0x10b   : > { %v212_v16 = vmul.f32 0.6931472, %v331_v15 }
 0x10d   : > { %v213_v17 = vadd.f32 %v212_v16, %v204_v4  ;;  %v224_v18 = vpop.xlane.xlu1 %223 }
 0x10f   : > { %v226_v20 = vsub.f32 %v213_v17, %v224_v18 }
 0x111   : > { %v227_v21 = vmul.f32 %v226_v20, %v225_v19 }
 0x113   : > { %229 = vst.msk [vmem:[%s199_s26] sm:$0xff] %vm228_vm2, %v227_v21 }
 0x114 PF: > { %s13_s12 = sadd.s32 1, %s338_s12  }
 0x115   : > { %p10_p4 = scmp.ge.s32.totalorder %s13_s12, 5  }
 0x117   :  { %12 = sbr.rel (!%p10_p4) target bundleno = 1 (0x1), region = 68 }

</bundles_post_ra>
